<compile_context>
chip_gen: v7x
topology: tpu7x:2x2x1
jax: 0.10.0
libtpu: 0.0.40
codegen_flags: <defaults>
</compile_context>

<pallas_src>
import functools
import math

import jax
import jax.numpy as jnp
from jax.experimental import pallas as pl
from jax.experimental.pallas import tpu as pltpu


def _round_up(n, m):
    return ((n + m - 1) // m) * m


def _default_vmem_limit():
    # 128 MiB physical on v5e/v6e, 64 MiB on v7x; leave headroom below physical.
    cap = 128 * 1024 * 1024
    try:
        info = pltpu.get_tpu_info()
        cap = int(getattr(info, "vmem_capacity_bytes", cap))
    except Exception:
        pass
    return min((cap * 3) // 4, 96 * 1024 * 1024)


_VMEM_LIMIT_BYTES = _default_vmem_limit()
_ROW_TILE_BUDGET = 6 * 1024 * 1024      # activation bytes per row-tile buffer
_WEIGHT_TILE_BUDGET = 8 * 1024 * 1024   # (K, tile_n) weight block budget


def _pick_row_tile(rows, bytes_per_row):
    """Row tile: large (roofline), never below an MXU-friendly height."""
    t = _ROW_TILE_BUDGET // max(bytes_per_row, 1)
    t = (t // 8) * 8
    t = max(t, 256)                 # keep the MXU fed even for wide K / N
    t = min(t, 1024)
    t = min(t, _round_up(rows, 8))
    return max(t, 8)


def _pick_col_tile(N, K, itemsize):
    """Weight-column tile: keep the (K, tile_n) block bounded in VMEM."""
    if N <= 512 or N * K * itemsize <= _WEIGHT_TILE_BUDGET:
        return N                    # full width resident (block == full dim)
    t = _WEIGHT_TILE_BUDGET // max(K * itemsize, 1)
    t = max(256, (t // 128) * 128)  # lane-dense multiples of 128
    return min(t, N)


# --------------------------------------------------------------------------- #
# Linear: y = x @ W + b   (optional fused residual add)                       #
# --------------------------------------------------------------------------- #
def _linear_kernel(x_ref, w_ref, b_ref, o_ref):
    y = jnp.dot(x_ref[...], w_ref[...], preferred_element_type=jnp.float32)
    y = y + b_ref[...].astype(jnp.float32)
    o_ref[...] = y.astype(o_ref.dtype)


def _linear_residual_kernel(x_ref, w_ref, b_ref, r_ref, o_ref):
    y = jnp.dot(x_ref[...], w_ref[...], preferred_element_type=jnp.float32)
    y = y + b_ref[...].astype(jnp.float32) + r_ref[...].astype(jnp.float32)
    o_ref[...] = y.astype(o_ref.dtype)


def linear(x2, w, b, residual=None):
    """x2: (M, K); w: (K, N); b: (N,); residual: optional (M, N) fused add."""
    M, K = x2.shape
    Kw, N = w.shape
    assert K == Kw
    itemsize = jnp.dtype(x2.dtype).itemsize
    b2 = b.reshape(1, N)

    tile_n = _pick_col_tile(N, K, itemsize)
    tile_m = _pick_row_tile(M, (K + 2 * tile_n) * itemsize)
    grid = (pl.cdiv(M, tile_m), pl.cdiv(N, tile_n))

    in_specs = [
        pl.BlockSpec((tile_m, K), lambda i, j: (i, 0)),
        pl.BlockSpec((K, tile_n), lambda i, j: (0, j)),
        pl.BlockSpec((1, tile_n), lambda i, j: (0, j)),
    ]
    args = [x2, w, b2]
    if residual is not None:
        in_specs.append(pl.BlockSpec((tile_m, tile_n), lambda i, j: (i, j)))
        args.append(residual)
        kernel = _linear_residual_kernel
    else:
        kernel = _linear_kernel

    bytes_acc = (M * K + K * N + N + M * N) * itemsize
    if residual is not None:
        bytes_acc += M * N * itemsize

    return pl.pallas_call(
        kernel,
        out_shape=jax.ShapeDtypeStruct((M, N), x2.dtype),
        grid_spec=pltpu.PrefetchScalarGridSpec(
            num_scalar_prefetch=0,
            grid=grid,
            in_specs=in_specs,
            out_specs=pl.BlockSpec((tile_m, tile_n), lambda i, j: (i, j)),
        ),
        compiler_params=pltpu.CompilerParams(
            dimension_semantics=("parallel", "parallel"),
            vmem_limit_bytes=_VMEM_LIMIT_BYTES,
        ),
        cost_estimate=pl.CostEstimate(
            flops=2 * M * K * N, transcendentals=0, bytes_accessed=bytes_acc),
    )(*args)


# --------------------------------------------------------------------------- #
# Fused LayerNorm + Linear: y = LN(x) @ W + b                                 #
#   LN matches the PyTorch module: unbiased std (ddof=1), eps added to std.   #
# --------------------------------------------------------------------------- #
def _ln_linear_kernel(x_ref, alpha_ref, lnb_ref, w_ref, b_ref, o_ref, *,
                      eps, features):
    xf = x_ref[...].astype(jnp.float32)
    n = jnp.float32(features)
    mean = jnp.sum(xf, axis=-1, keepdims=True) / n
    xc = xf - mean
    var = jnp.sum(xc * xc, axis=-1, keepdims=True) / (n - 1.0)   # unbiased
    inv = pl.reciprocal(jnp.sqrt(var) + eps, approx=False)
    xn = alpha_ref[...] * (xc * inv) + lnb_ref[...]
    # Feed the MXU in the model's native dtype; accumulate in f32.
    y = jnp.dot(xn.astype(x_ref.dtype), w_ref[...],
                preferred_element_type=jnp.float32)
    y = y + b_ref[...].astype(jnp.float32)
    o_ref[...] = y.astype(o_ref.dtype)


def ln_linear(x2, alpha, ln_bias, w, b, eps=1e-6):
    """x2: (M, K); alpha, ln_bias: (K,); w: (K, N); b: (N,)."""
    M, K = x2.shape
    Kw, N = w.shape
    assert K == Kw
    itemsize = jnp.dtype(x2.dtype).itemsize
    alpha2 = alpha.reshape(1, K).astype(jnp.float32)
    lnb2 = ln_bias.reshape(1, K).astype(jnp.float32)
    b2 = b.reshape(1, N)

    tile_n = _pick_col_tile(N, K, itemsize)
    tile_m = _pick_row_tile(M, (K + 2 * tile_n) * itemsize)
    grid = (pl.cdiv(M, tile_m), pl.cdiv(N, tile_n))
    kernel = functools.partial(_ln_linear_kernel, eps=eps, features=K)

    return pl.pallas_call(
        kernel,
        out_shape=jax.ShapeDtypeStruct((M, N), x2.dtype),
        grid_spec=pltpu.PrefetchScalarGridSpec(
            num_scalar_prefetch=0,
            grid=grid,
            in_specs=[
                pl.BlockSpec((tile_m, K), lambda i, j: (i, 0)),
                pl.BlockSpec((1, K), lambda i, j: (0, 0)),
                pl.BlockSpec((1, K), lambda i, j: (0, 0)),
                pl.BlockSpec((K, tile_n), lambda i, j: (0, j)),
                pl.BlockSpec((1, tile_n), lambda i, j: (0, j)),
            ],
            out_specs=pl.BlockSpec((tile_m, tile_n), lambda i, j: (i, j)),
        ),
        compiler_params=pltpu.CompilerParams(
            dimension_semantics=("parallel", "parallel"),
            vmem_limit_bytes=_VMEM_LIMIT_BYTES,
        ),
        cost_estimate=pl.CostEstimate(
            flops=2 * M * K * N + 8 * M * K,
            transcendentals=M,
            bytes_accessed=(M * K + K * N + N + 2 * K + M * N) * itemsize),
    )(x2, alpha2, lnb2, w, b2)


# --------------------------------------------------------------------------- #
# Multi-head attention core: one batch element per grid step, all heads,      #
# consumes the merged (S, 3D) qkv tile, emits a lane-dense (S, D) tile.       #
# --------------------------------------------------------------------------- #
def _attn_heads(q, k, v, mask, *, scale, h, dh, out_dtype):
    outs = []
    for head in range(h):
        sl = slice(head * dh, (head + 1) * dh)
        qh, kh, vh = q[:, sl], k[:, sl], v[:, sl]
        # q @ k^T with the transpose absorbed into the contraction dims.
        s = jax.lax.dot_general(qh, kh, (((1,), (1,)), ((), ())),
                                preferred_element_type=jnp.float32) * scale
        if mask is not None:
            s = jnp.where(mask == 0, -1e9, s)
        mx = jnp.max(s, axis=-1, keepdims=True)
        e = jnp.exp(s - mx)
        denom = jnp.sum(e, axis=-1, keepdims=True)
        attn = e * pl.reciprocal(denom, approx=True)      # EUP slot, ~free
        outs.append(jnp.dot(attn.astype(vh.dtype), vh,
                            preferred_element_type=jnp.float32))
    return jnp.concatenate(outs, axis=-1).astype(out_dtype)


def _attention_kernel(qkv_ref, o_ref, *, scale, h, dh, d):
    qkv = qkv_ref[0]                                       # (S, 3D)
    q, k, v = qkv[:, :d], qkv[:, d:2 * d], qkv[:, 2 * d:]
    o_ref[0] = _attn_heads(q, k, v, None, scale=scale, h=h, dh=dh,
                           out_dtype=o_ref.dtype)


def _attention_masked_kernel(qkv_ref, m_ref, o_ref, *, scale, h, dh, d):
    qkv = qkv_ref[0]
    q, k, v = qkv[:, :d], qkv[:, d:2 * d], qkv[:, 2 * d:]
    mask = m_ref[0, 0]                                     # (S, S)
    o_ref[0] = _attn_heads(q, k, v, mask, scale=scale, h=h, dh=dh,
                           out_dtype=o_ref.dtype)


def attention_core(qkv, mask, h):
    """qkv: (B, S, 3D); mask: None or (B_or_1, 1, S, S) -> (B, S, D)."""
    B, S, D3 = qkv.shape
    D = D3 // 3
    dh = D // h
    scale = 1.0 / math.sqrt(dh)
    itemsize = jnp.dtype(qkv.dtype).itemsize

    in_specs = [pl.BlockSpec((1, S, D3), lambda b: (b, 0, 0))]
    args = [qkv]
    bytes_acc = (B * S * D3 + B * S * D) * itemsize
    if mask is None:
        kernel = functools.partial(_attention_kernel, scale=scale, h=h, dh=dh, d=D)
    else:
        kernel = functools.partial(_attention_masked_kernel, scale=scale, h=h,
                                   dh=dh, d=D)
        if mask.shape[0] == 1:
            mask_map = lambda b: (0, 0, 0, 0)
        else:
            mask_map = lambda b: (b, 0, 0, 0)
        in_specs.append(pl.BlockSpec((1, 1, S, S), mask_map))
        args.append(mask)
        bytes_acc += mask.size * jnp.dtype(mask.dtype).itemsize

    return pl.pallas_call(
        kernel,
        out_shape=jax.ShapeDtypeStruct((B, S, D), qkv.dtype),
        grid_spec=pltpu.PrefetchScalarGridSpec(
            num_scalar_prefetch=0,
            grid=(B,),
            in_specs=in_specs,
            out_specs=pl.BlockSpec((1, S, D), lambda b: (b, 0, 0)),
        ),
        compiler_params=pltpu.CompilerParams(
            dimension_semantics=("parallel",),
            vmem_limit_bytes=_VMEM_LIMIT_BYTES,
        ),
        cost_estimate=pl.CostEstimate(
            flops=4 * B * S * S * D,
            transcendentals=B * h * S * S,
            bytes_accessed=bytes_acc),
    )(*args)


# --------------------------------------------------------------------------- #
# EncoderBlock forward                                                        #
# --------------------------------------------------------------------------- #
def encoder_block_forward(x, params, h, src_mask=None, eps=1e-6):
    B, S, D = x.shape
    x2 = x.reshape(B * S, D)

    # Merged QKV projection weights (x @ W orientation, concat output features).
    w_qkv = jnp.concatenate([params["wq"], params["wk"], params["wv"]], axis=1)
    b_qkv = jnp.concatenate([params["bq"], params["bk"], params["bv"]], axis=0)

    # --- residual_connection[0]: x + W_o(MHA(LN1(x))) ------------------------
    qkv = ln_linear(x2, params["ln1_alpha"], params["ln1_bias"],
                    w_qkv, b_qkv, eps)                     # (B*S, 3D)
    qkv = qkv.reshape(B, S, 3 * D)

    mask = None
    if src_mask is not None:
        m = jnp.asarray(src_mask)
        while m.ndim < 4:
            m = m[None]
        # TODO(synk): per-head masks (head dim > 1) are not supported here.
        assert m.shape[1] == 1, "per-head masks not supported"
        mask = jnp.broadcast_to(m, (m.shape[0], 1, S, S)).astype(jnp.float32)

    attn = attention_core(qkv, mask, h)                    # (B, S, D), heads merged
    x1 = linear(attn.reshape(B * S, D), params["wo"], params["bo"],
                residual=x2)                               # fused residual

    # --- residual_connection[1]: x1 + FFN(LN2(x1)) ---------------------------
    hmid = ln_linear(x1, params["ln2_alpha"], params["ln2_bias"],
                     params["w1"], params["b1"], eps)
    out = linear(hmid, params["w2"], params["b2"], residual=x1)   # fused residual
    return out.reshape(B, S, D)


# --------------------------------------------------------------------------- #
# Pure-JAX reference (mirrors the PyTorch module, dropout = identity)         #
# --------------------------------------------------------------------------- #
def reference_encoder_block(x, p, h, eps=1e-6, src_mask=None):
    def ln(t, a, b):
        mean = jnp.mean(t, axis=-1, keepdims=True)
        std = jnp.std(t, axis=-1, keepdims=True, ddof=1)
        return a * (t - mean) / (std + eps) + b

    B, S, D = x.shape
    dh = D // h
    xn = ln(x, p["ln1_alpha"], p["ln1_bias"])
    q = xn @ p["wq"] + p["bq"]
    k = xn @ p["wk"] + p["bk"]
    v = xn @ p["wv"] + p["bv"]
    q = q.reshape(B, S, h, dh).transpose(0, 2, 1, 3)
    k = k.reshape(B, S, h, dh).transpose(0, 2, 1, 3)
    v = v.reshape(B, S, h, dh).transpose(0, 2, 1, 3)
    scores = (q @ jnp.swapaxes(k, -1, -2)) / math.sqrt(dh)
    if src_mask is not None:
        scores = jnp.where(src_mask == 0, -1e9, scores)
    attn = jax.nn.softmax(scores, axis=-1)
    o = (attn @ v).transpose(0, 2, 1, 3).reshape(B, S, D)
    x1 = x + (o @ p["wo"] + p["bo"])
    xn2 = ln(x1, p["ln2_alpha"], p["ln2_bias"])
    ff = (xn2 @ p["w1"] + p["b1"]) @ p["w2"] + p["b2"]
    return x1 + ff


if __name__ == "__main__":
    batch, seq, d_model, d_ff, heads = 2, 8, 32, 64, 4
    key = jax.random.PRNGKey(0)
    ks = jax.random.split(key, 16)

    def lin_init(kw, kb, din, dout):
        w = jax.random.normal(kw, (din, dout), jnp.float32) / math.sqrt(din)
        b = 0.01 * jax.random.normal(kb, (dout,), jnp.float32)
        return w, b

    wq, bq = lin_init(ks[0], ks[1], d_model, d_model)
    wk, bk = lin_init(ks[2], ks[3], d_model, d_model)
    wv, bv = lin_init(ks[4], ks[5], d_model, d_model)
    wo, bo = lin_init(ks[6], ks[7], d_model, d_model)
    w1, b1 = lin_init(ks[8], ks[9], d_model, d_ff)
    w2, b2 = lin_init(ks[10], ks[11], d_ff, d_model)

    params = dict(
        wq=wq, bq=bq, wk=wk, bk=bk, wv=wv, bv=bv, wo=wo, bo=bo,
        w1=w1, b1=b1, w2=w2, b2=b2,
        ln1_alpha=jnp.ones((d_model,), jnp.float32),
        ln1_bias=jnp.zeros((d_model,), jnp.float32),
        ln2_alpha=jnp.ones((d_model,), jnp.float32),
        ln2_bias=jnp.zeros((d_model,), jnp.float32),
    )

    x = jax.random.normal(ks[12], (batch, seq, d_model), jnp.float32)

    # --- mask-free path -------------------------------------------------------
    out = encoder_block_forward(x, params, heads, src_mask=None)
    out = jax.block_until_ready(out)
    ref = reference_encoder_block(x, params, heads)
    assert out.shape == ref.shape
    max_err = float(jnp.max(jnp.abs(out - ref)))
    assert jnp.allclose(out, ref, atol=2e-2, rtol=2e-2), f"max_err={max_err}"

    # --- masked path (key-padding style mask, broadcast across heads) --------
    key_mask = (jnp.arange(seq) < seq - 2).astype(jnp.float32)   # (S,)
    src_mask = key_mask[None, None, None, :]                     # (1, 1, 1, S)
    out_m = encoder_block_forward(x, params, heads, src_mask=src_mask)
    out_m = jax.block_until_ready(out_m)
    ref_m = reference_encoder_block(x, params, heads, src_mask=src_mask)
    max_err_m = float(jnp.max(jnp.abs(out_m - ref_m)))
    assert jnp.allclose(out_m, ref_m, atol=2e-2, rtol=2e-2), f"max_err={max_err_m}"

    print("KERNEL_OK")
</pallas_src>

<mosaic_0001>
module attributes {stable_mosaic.version = 11 : i64} {
  func.func @_ln_linear_kernel(%arg0: i32, %arg1: i32, %arg2: memref<16x32xf32, #tpu.memory_space<vmem>>, %arg3: memref<1x32xf32, #tpu.memory_space<vmem>>, %arg4: memref<1x32xf32, #tpu.memory_space<vmem>>, %arg5: memref<32x96xf32, #tpu.memory_space<vmem>>, %arg6: memref<1x96xf32, #tpu.memory_space<vmem>>, %arg7: memref<16x96xf32, #tpu.memory_space<vmem>>) attributes {dimension_semantics = [#tpu.dimension_semantics<parallel>, #tpu.dimension_semantics<parallel>], iteration_bounds = array<i64: 1, 1>, scalar_prefetch = 0 : i64, scratch_operands = 0 : i64, tpu.core_type = #tpu.core_type<tc>, window_params = [{transform_indices = @transform_0, window_bounds = array<i64: 16, 32>}, {pipeline_mode = #tpu.pipeline_mode<synchronous>, transform_indices = @transform_1, window_bounds = array<i64: 1, 32>}, {pipeline_mode = #tpu.pipeline_mode<synchronous>, transform_indices = @transform_2, window_bounds = array<i64: 1, 32>}, {transform_indices = @transform_3, window_bounds = array<i64: 32, 96>}, {transform_indices = @transform_4, window_bounds = array<i64: 1, 96>}, {transform_indices = @transform_5, window_bounds = array<i64: 16, 96>}]} {
    %c0 = arith.constant 0 : index
    %c0_0 = arith.constant 0 : index
    %0 = vector.load %arg2[%c0, %c0_0] : memref<16x32xf32, #tpu.memory_space<vmem>>, vector<16x32xf32>
    %cst = arith.constant dense<0.000000e+00> : vector<16xf32>
    %1 = vector.multi_reduction <add>, %0, %cst [1] : vector<16x32xf32> to vector<16xf32>
    %2 = vector.shape_cast %1 : vector<16xf32> to vector<16x1xf32>
    %cst_1 = arith.constant 3.200000e+01 : f32
    %3 = vector.broadcast %cst_1 : f32 to vector<16x1xf32>
    %4 = arith.divf %2, %3 : vector<16x1xf32>
    %5 = vector.broadcast %4 : vector<16x1xf32> to vector<16x32xf32>
    %6 = arith.subf %0, %5 : vector<16x32xf32>
    %7 = arith.mulf %6, %6 : vector<16x32xf32>
    %cst_2 = arith.constant dense<0.000000e+00> : vector<16xf32>
    %8 = vector.multi_reduction <add>, %7, %cst_2 [1] : vector<16x32xf32> to vector<16xf32>
    %9 = vector.shape_cast %8 : vector<16xf32> to vector<16x1xf32>
    %cst_3 = arith.constant 3.200000e+01 : f32
    %cst_4 = arith.constant 1.000000e+00 : f32
    %10 = arith.subf %cst_3, %cst_4 : f32
    %11 = vector.broadcast %10 : f32 to vector<16x1xf32>
    %12 = arith.divf %9, %11 : vector<16x1xf32>
    %13 = math.sqrt %12 : vector<16x1xf32>
    %cst_5 = arith.constant 9.99999997E-7 : f32
    %14 = vector.broadcast %cst_5 : f32 to vector<16x1xf32>
    %15 = arith.addf %13, %14 : vector<16x1xf32>
    %16 = tpu.reciprocal %15 : vector<16x1xf32> -> vector<16x1xf32>
    %c0_6 = arith.constant 0 : index
    %c0_7 = arith.constant 0 : index
    %17 = vector.load %arg3[%c0_6, %c0_7] : memref<1x32xf32, #tpu.memory_space<vmem>>, vector<1x32xf32>
    %18 = vector.broadcast %16 : vector<16x1xf32> to vector<16x32xf32>
    %19 = arith.mulf %6, %18 : vector<16x32xf32>
    %20 = vector.broadcast %17 : vector<1x32xf32> to vector<16x32xf32>
    %21 = arith.mulf %20, %19 : vector<16x32xf32>
    %c0_8 = arith.constant 0 : index
    %c0_9 = arith.constant 0 : index
    %22 = vector.load %arg4[%c0_8, %c0_9] : memref<1x32xf32, #tpu.memory_space<vmem>>, vector<1x32xf32>
    %23 = vector.broadcast %22 : vector<1x32xf32> to vector<16x32xf32>
    %24 = arith.addf %21, %23 : vector<16x32xf32>
    %c0_10 = arith.constant 0 : index
    %c0_11 = arith.constant 0 : index
    %25 = vector.load %arg5[%c0_10, %c0_11] : memref<32x96xf32, #tpu.memory_space<vmem>>, vector<32x96xf32>
    %cst_12 = arith.constant dense<0.000000e+00> : vector<16x96xf32>
    %26 = tpu.matmul %24, %25, %cst_12 {dimension_numbers = #tpu.dot_dimension_numbers<[1], [0], [0], [1], [0, 0, 1, 1], [], []>} : vector<16x32xf32>, vector<32x96xf32>, vector<16x96xf32> -> vector<16x96xf32>
    %c0_13 = arith.constant 0 : index
    %c0_14 = arith.constant 0 : index
    %27 = vector.load %arg6[%c0_13, %c0_14] : memref<1x96xf32, #tpu.memory_space<vmem>>, vector<1x96xf32>
    %28 = vector.broadcast %27 : vector<1x96xf32> to vector<16x96xf32>
    %29 = arith.addf %26, %28 : vector<16x96xf32>
    %c0_15 = arith.constant 0 : index
    %c0_16 = arith.constant 0 : index
    %30 = vector.load %arg7[%c0_15, %c0_16] : memref<16x96xf32, #tpu.memory_space<vmem>>, vector<16x96xf32>
    tpu.vector_store %arg7[%c0_15, %c0_16], %29 {strides = array<i32>} : memref<16x96xf32, #tpu.memory_space<vmem>>, vector<16x96xf32>,
    return
  }
  func.func @transform_0(%arg0: i32, %arg1: i32) -> (i32, i32) {
    %c0_i32 = arith.constant 0 : i32
    %c0_i32_0 = arith.constant 0 : i32
    return %arg0, %c0_i32 : i32, i32
  }
  func.func @transform_1(%arg0: i32, %arg1: i32) -> (i32, i32) {
    %c0_i32 = arith.constant 0 : i32
    %c0_i32_0 = arith.constant 0 : i32
    %c0_i32_1 = arith.constant 0 : i32
    return %c0_i32, %c0_i32_0 : i32, i32
  }
  func.func @transform_2(%arg0: i32, %arg1: i32) -> (i32, i32) {
    %c0_i32 = arith.constant 0 : i32
    %c0_i32_0 = arith.constant 0 : i32
    %c0_i32_1 = arith.constant 0 : i32
    return %c0_i32, %c0_i32_0 : i32, i32
  }
  func.func @transform_3(%arg0: i32, %arg1: i32) -> (i32, i32) {
    %c0_i32 = arith.constant 0 : i32
    %c0_i32_0 = arith.constant 0 : i32
    return %c0_i32, %arg1 : i32, i32
  }
  func.func @transform_4(%arg0: i32, %arg1: i32) -> (i32, i32) {
    %c0_i32 = arith.constant 0 : i32
    %c0_i32_0 = arith.constant 0 : i32
    return %c0_i32, %arg1 : i32, i32
  }
  func.func @transform_5(%arg0: i32, %arg1: i32) -> (i32, i32) {
    %c0_i32 = arith.constant 0 : i32
    return %arg0, %arg1 : i32, i32
  }
}

</mosaic_0001>

<bundles_post_ra>
// kernel: tpu_custom_call.1
= control target key start
LH: loop header
LB: loop body
LE: loop exit
PB: predicated region body
PF: predicated region fallthrough
CT: control target
= control target key end

     0   :  { %10 = vsyncpa [#allocation3], 0  ;;  %s571_s0 = inlined_call_operand.hbm [shape: f32[16,32], index: 0, kind: input, shape index: {}]   ;;  %s572_s1 = inlined_call_operand.hbm [shape: f32[1,32], index: 1, kind: input, shape index: {}]   ;;  %s573_s2 = inlined_call_operand.hbm [shape: f32[1,32], index: 2, kind: input, shape index: {}]   ;;  %s574_s3 = inlined_call_operand.hbm [shape: f32[32,96], index: 3, kind: input, shape index: {}]   ;;  %s575_s4 = inlined_call_operand.hbm [shape: f32[1,96], index: 4, kind: input, shape index: {}]   ;;  %s576_s5 = inlined_call_operand.hbm [shape: f32[16,96], index: 5, kind: output, shape index: {}]  }
   0x1   :  { %11 = vsyncpa [#allocation6], 0 }
   0x2   :  { %12 = vsyncpa [#allocation9], 0 }
   0x3   :  { %13 = vsyncpa [#allocation4], 0  ;;  %s446_s18 = smov [#allocation5]   ;;  %s306_s22 = scalar_lea.hbm %s572_s1, 16 }
   0x4   :  { %s32_s19 = sshll.u32 %s446_s18, 4  ;;  %p307_p0 = scmp.ne.s32.totalorder %s572_s1, %s306_s22  ;;  %s33_s19 = int_to_ptr.vmem [resolvable:$true] %s32_s19 }
   0x5   :  { %p310_p1 = scmp.lt.u32.totalorder %s306_s22, %s572_s1 }
   0x7   :  { %p312_p2 = pnand %p310_p1, %p307_p0 }
   0x9   :  { %315 = shalt.err (!%p312_p2)
}
   0xa   :  { %s316_s27 = scalar_lea.vmem %s33_s19, 16  ;;  %s320_s28 = scalar_lea.vmem %s33_s19, 32 }
   0xb   :  { %p317_p3 = scmp.ne.s32.totalorder %s33_s19, %s316_s27  ;;  %p321_p4 = scmp.lt.s32.totalorder %s33_s19, %s33_s19 }
   0xc   :  { %p322_p5 = scmp.lt.s32.totalorder %s320_s28, %s316_s27 }
   0xe   :  { %p323_p6 = por %p322_p5, %p321_p4 }
  0x10   :  { %p324_p7 = pnand %p323_p6, %p317_p3 }
  0x12   :  { %327 = shalt.err (!%p324_p7)
}
  0x13   :  { %35 = dma.hbm_to_vmem [thread:$0]  %s572_s1, 16, %s33_s19, [#allocation6]  }
  0x14   :  { %s447_s6 = smov [#allocation8]   ;;  %s448_s8 = smov [#allocation2]  }
  0x15   :  { %s51_s7 = sshll.u32 %s447_s6, 4  ;;  %s19_s9 = sshll.u32 %s448_s8, 4  ;;  %s52_s7 = int_to_ptr.vmem [resolvable:$true] %s51_s7  ;;  %s20_s9 = int_to_ptr.vmem [resolvable:$true] %s19_s9 }
  0x16   :  { %s328_s12 = scalar_lea.hbm %s574_s3, 512 }
  0x17   :  { %p329_p8 = scmp.ne.s32.totalorder %s574_s3, %s328_s12  ;;  %p332_p9 = scmp.lt.u32.totalorder %s328_s12, %s574_s3 }
  0x19   :  { %p334_p10 = pnand %p332_p9, %p329_p8 }
  0x1b   :  { %337 = shalt.err (!%p334_p10)
}
  0x1c   :  { %s338_s1 = scalar_lea.vmem %s52_s7, 512  ;;  %p343_p12 = scmp.lt.s32.totalorder %s52_s7, %s52_s7 }
  0x1d   :  { %p339_p11 = scmp.ne.s32.totalorder %s52_s7, %s338_s1  ;;  %p344_p13 = scmp.lt.s32.totalorder %s338_s1, %s338_s1 }
  0x1f   :  { %p345_p0 = por %p344_p13, %p343_p12 }
  0x21   :  { %p346_p1 = pnand %p345_p0, %p339_p11 }
  0x23   :  { %349 = shalt.err (!%p346_p1)
}
  0x24   :  { %s449_s17 = smov 128   ;;  %s450_s18 = smov 8  }
  0x25   :  { %57 = dma.hbm_to_vmem [thread:$0]  %s574_s3, 512, %s52_s7, [#allocation9], %s449_s17, %s449_s17, %s450_s18  }
  0x26   :  { %s350_s23 = scalar_lea.hbm %s571_s0, 256 }
  0x27   :  { %p351_p2 = scmp.ne.s32.totalorder %s571_s0, %s350_s23  ;;  %p354_p3 = scmp.lt.u32.totalorder %s350_s23, %s571_s0 }
  0x29   :  { %p356_p4 = pnand %p354_p3, %p351_p2 }
  0x2b   :  { %359 = shalt.err (!%p356_p4)
}
  0x2c   :  { %s360_s28 = scalar_lea.vmem %s20_s9, 256  ;;  %p365_p6 = scmp.lt.s32.totalorder %s20_s9, %s20_s9 }
  0x2d   :  { %p361_p5 = scmp.ne.s32.totalorder %s20_s9, %s360_s28  ;;  %p366_p7 = scmp.lt.s32.totalorder %s360_s28, %s360_s28 }
  0x2f   :  { %p367_p8 = por %p366_p7, %p365_p6 }
  0x31   :  { %p368_p9 = pnand %p367_p8, %p361_p5 }
  0x33   :  { %371 = shalt.err (!%p368_p9)
}
  0x34   :  { %25 = dma.hbm_to_vmem [thread:$0]  %s571_s0, 256, %s20_s9, [#allocation3], %s449_s17, %s449_s17, %s450_s18  }
  0x35   :  { %s451_s30 = smov [#allocation7]   ;;  %s452_s7 = smov [#allocation10]  }
  0x36   :  { %s42_s6 = sshll.u32 %s451_s30, 4  ;;  %s64_s8 = sshll.u32 %s452_s7, 4  ;;  %s43_s6 = int_to_ptr.vmem [resolvable:$true] %s42_s6  ;;  %s65_s8 = int_to_ptr.vmem [resolvable:$true] %s64_s8 }
  0x37   :  { %s372_s12 = scalar_lea.hbm %s573_s2, 16 }
  0x38   :  { %p373_p10 = scmp.ne.s32.totalorder %s573_s2, %s372_s12  ;;  %p376_p11 = scmp.lt.u32.totalorder %s372_s12, %s573_s2 }
  0x3a   :  { %p378_p12 = pnand %p376_p11, %p373_p10 }
  0x3c   :  { %381 = shalt.err (!%p378_p12)
}
  0x3d   :  { %s382_s0 = scalar_lea.vmem %s43_s6, 16  ;;  %s386_s9 = scalar_lea.vmem %s43_s6, 32 }
  0x3e   :  { %p383_p13 = scmp.ne.s32.totalorder %s43_s6, %s382_s0  ;;  %p387_p0 = scmp.lt.s32.totalorder %s43_s6, %s43_s6 }
  0x3f   :  { %p388_p1 = scmp.lt.s32.totalorder %s386_s9, %s382_s0 }
  0x41   :  { %p389_p2 = por %p388_p1, %p387_p0 }
  0x43   :  { %p390_p3 = pnand %p389_p2, %p383_p13 }
  0x45   :  { %393 = shalt.err (!%p390_p3)
}
  0x46   :  { %45 = dma.hbm_to_vmem [thread:$0]  %s573_s2, 16, %s43_s6, [#allocation6]  }
  0x47   :  { %s394_s22 = scalar_lea.hbm %s575_s4, 16 }
  0x48   :  { %p395_p4 = scmp.ne.s32.totalorder %s575_s4, %s394_s22  ;;  %p398_p5 = scmp.lt.u32.totalorder %s394_s22, %s575_s4 }
  0x4a   :  { %p400_p6 = pnand %p398_p5, %p395_p4 }
  0x4c   :  { %403 = shalt.err (!%p400_p6)
}
  0x4d   :  { %s404_s27 = scalar_lea.vmem %s65_s8, 16  ;;  %s408_s28 = scalar_lea.vmem %s65_s8, 32 }
  0x4e   :  { %p405_p7 = scmp.ne.s32.totalorder %s65_s8, %s404_s27  ;;  %p409_p8 = scmp.lt.s32.totalorder %s65_s8, %s65_s8 }
  0x4f   :  { %p410_p9 = scmp.lt.s32.totalorder %s408_s28, %s404_s27 }
  0x51   :  { %p411_p10 = por %p410_p9, %p409_p8 }
  0x53   :  { %p412_p11 = pnand %p411_p10, %p405_p7 }
  0x55   :  { %415 = shalt.err (!%p412_p11)
}
  0x56   :  { %67 = dma.hbm_to_vmem [thread:$0]  %s575_s4, 16, %s65_s8, [#allocation9]  }
  0x57   :  { %438 = dma.done.wait [#allocation3], 256  }
  0x58   :  { %439 = vsyncadd [#allocation3], 4294967040 }
  0x59   :  { %440 = dma.done.wait [#allocation6], 32  }
  0x5a   :  { %441 = vsyncadd [#allocation6], 4294967264 }
  0x5b   :  { %442 = dma.done.wait [#allocation9], 528  }
  0x5c   :  { %443 = vsyncadd [#allocation9], 4294966768  ;;  %vm85_vm0 = vcmask 261120   ;;  %v83_v0 = vld [vmem:[#allocation2] sm:$0xff]  ;;  %v84_v1 = vld [vmem:[#allocation2 + $0x8] sm:$0xff]  ;;  %s453_s4 = smov [#allocation11]  }
  0x5d   :  { %v86_v2 = vsel %vm85_vm0, %v83_v0, 0.0  ;;  %v89_v3 = vsel %vm85_vm0, %v84_v1, 0.0  ;;  %v146_v14 = vld [vmem:[#allocation8] sm:$0xff]  ;;  %v147_v15 = vld [vmem:[#allocation8 + $0x8] sm:$0xff]  ;;  %v148_v16 = vld [vmem:[#allocation8 + $0x10] sm:$0xff]  ;;  %s246_s29 = sshll.u32 %s453_s4, 4  ;;  %s247_s29 = int_to_ptr.vmem [resolvable:$true] %s246_s29 }
  0x5e   :  { %87 = vadd.xlane.f32.xlu0 %v86_v2  ;;  %v282_v17 = vpack.c.bf16 %v147_v15, %v146_v14  ;;  %v149_v18 = vld [vmem:[#allocation8 + $0x18] sm:$0xff]  ;;  %v262_v46 = vld [vmem:[#allocation10] ss:$0 sm:$0xff]  ;;  %vm238_vm5 = vcmask 785408   ;;  %s416_s30 = scalar_lea.vmem %s247_s29, 256  ;;  %p421_p13 = scmp.lt.s32.totalorder %s247_s29, %s247_s29 }
  0x5f   :  { %v286_v19 = vpack.c.bf16 %v149_v18, %v148_v16  ;;  %v260_v37 = vld [vmem:[#allocation5] ss:$0 sm:$0xff]  ;;  %v261_v39 = vld [vmem:[#allocation7] ss:$0 sm:$0xff]  ;;  %p417_p12 = scmp.ne.s32.totalorder %s247_s29, %s416_s30  ;;  %p422_p0 = scmp.lt.s32.totalorder %s416_s30, %s416_s30 }
  0x60   :  { %283 = vmatprep.subr.bf16.mxu0 %v282_v17 }
  0x61   :  { %285 = vmatpush3.bf16.msra.mxu0 %v282_v17  ;;  %p423_p1 = por %p422_p0, %p421_p13 }
  0x62   :  { %90 = vadd.xlane.f32.xlu0 %v89_v3  ;;  %287 = vmatprep.subr.bf16.mxu0 %v286_v19 }
  0x63   :  { %p424_p2 = pnand %p423_p1, %p417_p12 }
  0x65   :  { %289 = vmatpush3.bf16.msra.mxu0 %v286_v19 }
  0xeb   :  { %v88_v4 = vpop.xlane.xlu0 %87 }
  0xec   :  { %v93_v5 = vmul.f32 0.03125, %v88_v4 }
  0xee   :  { %v95_v6 = vsub.f32 %v83_v0, %v93_v5 }
  0xef   :  { %v91_v7 = vpop.xlane.xlu0 %90 }
  0xf0   :  { %v94_v8 = vmul.f32 0.03125, %v91_v7  ;;  %v97_v9 = vmul.f32 %v95_v6, %v95_v6 }
  0xf2   :  { %v96_v10 = vsub.f32 %v84_v1, %v94_v8  ;;  %v99_v11 = vsel %vm85_vm0, %v97_v9, 0.0 }
  0xf3   :  { %100 = vadd.xlane.f32.xlu1 %v99_v11 }
  0xf4   :  { %v98_v12 = vmul.f32 %v96_v10, %v96_v10 }
  0xf6   :  { %v102_v13 = vsel %vm85_vm0, %v98_v12, 0.0 }
  0xf7   :  { %103 = vadd.xlane.f32.xlu1 %v102_v13 }
 0x180   :  { %v101_v20 = vpop.xlane.xlu1 %100 }
 0x181   :  { %v106_v21 = vmul.f32 0.032258064, %v101_v20 }
 0x183   :  { %298 = vrsqrt.f32 %v106_v21  ;;  %vm110_vm1 = vcmp.eq.f32.partialorder %v106_v21, inf  ;;  %v113_v26 = vand.u32 2147483648, %v106_v21  ;;  %vm112_vm2 = vcmp.eq.f32.partialorder %v106_v21, 0.0 }
 0x184   :  { %v104_v22 = vpop.xlane.xlu1 %103 }
 0x185   :  { %v107_v23 = vmul.f32 0.032258064, %v104_v22 }
 0x187   :  { %300 = vrsqrt.f32 %v107_v23  ;;  %vm117_vm3 = vcmp.eq.f32.partialorder %v107_v23, inf  ;;  %v120_v32 = vand.u32 2147483648, %v107_v23  ;;  %vm119_vm4 = vcmp.eq.f32.partialorder %v107_v23, 0.0 }
 0x18d   :  { %v299_v24 = vpop.eup %298 }
 0x18e   :  { %v109_v25 = vmul.f32 %v299_v24, %v106_v21 }
 0x190   :  { %v111_v27 = vsel %vm110_vm1, %v106_v21, %v109_v25 }
 0x191   :  { %v301_v28 = vpop.eup %300  ;;  %v114_v29 = vsel %vm112_vm2, %v113_v26, %v111_v27 }
 0x192   :  { %v116_v30 = vmul.f32 %v301_v28, %v107_v23  ;;  %v122_v31 = vadd.f32 1e-06, %v114_v29 }
 0x194   :  { %v118_v33 = vsel %vm117_vm3, %v107_v23, %v116_v30  ;;  %302 = vrcp.f32 %v122_v31 }
 0x195   :  { %v121_v34 = vsel %vm119_vm4, %v120_v32, %v118_v33 }
 0x196   :  { %v123_v35 = vadd.f32 1e-06, %v121_v34 }
 0x198   :  { %304 = vrcp.f32 %v123_v35 }
 0x19e   :  { %v303_v36 = vpop.eup %302 }
 0x19f   :  { %v127_v38 = vmul.f32 %v303_v36, %v95_v6 }
 0x1a1   :  { %v135_v40 = vmul.f32 %v260_v37, %v127_v38 }
 0x1a2   :  { %v305_v41 = vpop.eup %304 }
 0x1a3   :  { %v128_v42 = vmul.f32 %v305_v41, %v96_v10  ;;  %v144_v43 = vadd.f32 %v261_v39, %v135_v40 }
 0x1a5   :  { %v136_v44 = vmul.f32 %v260_v37, %v128_v42  ;;  %279 = vmatprep.mubr.msk.f32.mxu0 %vm85_vm0, %v144_v43 }
 0x1a7   :  { %v145_v45 = vadd.f32 %v261_v39, %v136_v44 }
 0x1a9   :  { %280 = vmatmul.mubr.msk.f32.vlgmr.msra.gmra.mrb[0].mxu0 %vm85_vm0, %v145_v45 }
 0x27c   :  { %v281_v47 = vpop.f32.mrb[0].mxu0 }
 0x27d   :  { %v235_v48 = vadd.f32 %v281_v47, %v262_v46  ;;  %v229_v49 = vpop.f32.mrb[1].mxu0 }
 0x27e   :  { %v230_v50 = vadd.f32 %v262_v46, %v229_v49 }
 0x27f   :  { %240 = vst.msk [vmem:[#allocation11 + $0x8] sm:$0xff] %vm238_vm5, %v235_v48 }
 0x280   :  { %239 = vst.msk [vmem:[#allocation11] sm:$0xff] %vm238_vm5, %v230_v50 }
 0x281   :  { %427 = shalt.err (!%p424_p2)
}
 0x282   :  { %s428_s8 = scalar_lea.hbm %s576_s5, 256 }
 0x283   :  { %p429_p3 = scmp.ne.s32.totalorder %s576_s5, %s428_s8  ;;  %p432_p4 = scmp.lt.u32.totalorder %s428_s8, %s576_s5 }
 0x285   :  { %p434_p5 = pnand %p432_p4, %p429_p3 }
 0x287   :  { %437 = shalt.err (!%p434_p5)
}
 0x288   :  { %252 = dma.vmem_to_hbm [thread:$0]  %s247_s29, 256, %s576_s5, [#allocation4], %s449_s17, %s449_s17, %s450_s18  }
 0x289   :  { %444 = dma.done.wait [#allocation4], 256  }
 0x28a   :  { %445 = vsyncadd [#allocation4], 4294967040 }
 0x28b   :  { %256 = vsyncpa [#allocation3], 1 }
 0x28c   :  { %257 = vsyncpa [#allocation6], 1 }
 0x28d   :  { %258 = vsyncpa [#allocation9], 1 }
 0x28e   :  { %259 = vsyncpa [#allocation4], 1 }

</bundles_post_ra>
